<compile_context>
chip_gen: v7x
topology: tpu7x:2x2x1
jax: 0.10.0
libtpu: 0.0.40
codegen_flags: <defaults>
</compile_context>

<pallas_src>
import jax
import jax.numpy as jnp
from jax.experimental import pallas as pl
from jax.experimental.pallas import tpu as pltpu


def _lm_head_kernel(x_ref, w_ref, o_ref):
    # x_ref: (tm, K)  activation tile
    # w_ref: (K, tn)  pre-transposed tied-embedding tile (contraction on sublanes)
    # o_ref: (tm, tn) logits tile
    o_ref[...] = jnp.dot(
        x_ref[...], w_ref[...], preferred_element_type=jnp.float32
    ).astype(o_ref.dtype)


def _round_up(x: int, m: int) -> int:
    return (x + m - 1) // m * m


def gpt2_lm_head(
    hidden_state: jax.Array,
    embed_weight: jax.Array,
    *,
    tm: int = 256,
    tn: int = 512,
    compute_dtype=None,
):
    """lm_logits = hidden_state @ embed_weight.T  (nn.Linear, bias=False, tied weight).

    hidden_state: (B, S, n_embd)
    embed_weight: (vocab_size, n_embd)
    returns:      (B, S, vocab_size), dtype == hidden_state.dtype
    """
    B, S, K = hidden_state.shape
    V, K_w = embed_weight.shape
    assert K == K_w, "n_embd mismatch between hidden_state and embedding weight"

    out_dtype = hidden_state.dtype
    if compute_dtype is None:
        # Match the module: compute in the activation dtype (pass bf16 activations
        # or compute_dtype=jnp.bfloat16 explicitly for the fast path).
        compute_dtype = hidden_state.dtype

    M = B * S
    M_pad = _round_up(M, tm)
    V_pad = _round_up(V, tn)

    # Flatten tokens; pad token dim to a multiple of tm (padded rows are discarded).
    x2d = hidden_state.reshape(M, K).astype(compute_dtype)
    if M_pad != M:
        x2d = jnp.pad(x2d, ((0, M_pad - M), (0, 0)))

    # Pre-transpose the tied embedding once outside the kernel -> (K, V),
    # pad vocab to a multiple of tn so every output store is a full lane-dense tile.
    w_kn = embed_weight.astype(compute_dtype).T
    if V_pad != V:
        w_kn = jnp.pad(w_kn, ((0, 0), (0, V_pad - V)))

    grid = (M_pad // tm, V_pad // tn)  # M outer, V inner: x tile stays resident per row

    in_itemsize = jnp.dtype(compute_dtype).itemsize
    cost = pl.CostEstimate(
        flops=2 * M_pad * V_pad * K,
        transcendentals=0,
        bytes_accessed=(
            M_pad * K * in_itemsize
            + K * V_pad * in_itemsize
            + M_pad * V_pad * jnp.dtype(out_dtype).itemsize
        ),
    )

    out2d = pl.pallas_call(
        _lm_head_kernel,
        out_shape=jax.ShapeDtypeStruct((M_pad, V_pad), out_dtype),
        grid_spec=pl.GridSpec(
            grid=grid,
            in_specs=[
                # (tm, K) activation tile; constant across the inner vocab axis so
                # it is fetched once per outer step.
                pl.BlockSpec((tm, K), lambda i, j: (i, 0)),
                # (K, tn) weight tile streamed along the vocab axis.
                pl.BlockSpec((K, tn), lambda i, j: (0, j)),
            ],
            out_specs=pl.BlockSpec((tm, tn), lambda i, j: (i, j)),
        ),
        compiler_params=pltpu.CompilerParams(
            dimension_semantics=("parallel", "parallel"),
            # Tiles above stay well under this (~11 MiB double-buffered at
            # tm=256, tn=512, K=1600 f32); raised above the v5e 16 MiB default.
            vmem_limit_bytes=32 * 1024 * 1024,
        ),
        cost_estimate=cost,
    )(x2d, w_kn)

    # TODO(synk): fusing the downstream log-softmax / loss into this kernel would
    # remove the (M, V) logits writeback entirely; left unfused to preserve the
    # module's forward() signature.
    return out2d[:M, :V].reshape(B, S, V)


if __name__ == "__main__":
    # Small, deterministic example shapes consistent with the module.
    # vocab=250 is deliberately NOT a multiple of the tile to exercise padding.
    B, S, n_embd, vocab = 2, 8, 32, 250

    key = jax.random.PRNGKey(0)
    k_h, k_w = jax.random.split(key)

    hidden_state = jax.random.normal(k_h, (B, S, n_embd), dtype=jnp.float32)
    embed_weight = jax.random.normal(k_w, (vocab, n_embd), dtype=jnp.float32) * 0.02

    # --- f32 path (exact module semantics) ---
    logits = gpt2_lm_head(hidden_state, embed_weight)
    jax.block_until_ready(logits)

    ref = jnp.einsum("bsk,vk->bsv", hidden_state, embed_weight)
    assert logits.shape == (B, S, vocab)
    assert logits.dtype == hidden_state.dtype
    assert jnp.allclose(logits, ref, atol=1e-4, rtol=1e-4)

    # --- bf16 compute path (halved weight DMA, f32 accumulation) ---
    logits_bf16 = gpt2_lm_head(
        hidden_state.astype(jnp.bfloat16), embed_weight, compute_dtype=jnp.bfloat16
    )
    jax.block_until_ready(logits_bf16)
    ref_bf16 = jnp.einsum(
        "bsk,vk->bsv",
        hidden_state.astype(jnp.bfloat16).astype(jnp.float32),
        embed_weight.astype(jnp.bfloat16).astype(jnp.float32),
    )
    assert logits_bf16.dtype == jnp.bfloat16
    assert jnp.allclose(
        logits_bf16.astype(jnp.float32), ref_bf16, atol=2e-2, rtol=2e-2
    )

    print("KERNEL_OK")
</pallas_src>

<mosaic_0001>
module attributes {stable_mosaic.version = 11 : i64} {
  func.func @_lm_head_kernel(%arg0: i32, %arg1: i32, %arg2: memref<256x32xf32, #tpu.memory_space<vmem>>, %arg3: memref<32x512xf32, #tpu.memory_space<vmem>>, %arg4: memref<256x512xf32, #tpu.memory_space<vmem>>) attributes {dimension_semantics = [#tpu.dimension_semantics<parallel>, #tpu.dimension_semantics<parallel>], iteration_bounds = array<i64: 1, 1>, scalar_prefetch = 0 : i64, scratch_operands = 0 : i64, tpu.core_type = #tpu.core_type<tc>, window_params = [{transform_indices = @transform_0, window_bounds = array<i64: 256, 32>}, {transform_indices = @transform_1, window_bounds = array<i64: 32, 512>}, {transform_indices = @transform_2, window_bounds = array<i64: 256, 512>}]} {
    %c0 = arith.constant 0 : index
    %c0_0 = arith.constant 0 : index
    %0 = vector.load %arg2[%c0, %c0_0] : memref<256x32xf32, #tpu.memory_space<vmem>>, vector<256x32xf32>
    %c0_1 = arith.constant 0 : index
    %c0_2 = arith.constant 0 : index
    %1 = vector.load %arg3[%c0_1, %c0_2] : memref<32x512xf32, #tpu.memory_space<vmem>>, vector<32x512xf32>
    %cst = arith.constant dense<0.000000e+00> : vector<256x512xf32>
    %2 = tpu.matmul %0, %1, %cst {dimension_numbers = #tpu.dot_dimension_numbers<[1], [0], [0], [1], [0, 0, 1, 1], [], []>} : vector<256x32xf32>, vector<32x512xf32>, vector<256x512xf32> -> vector<256x512xf32>
    %c0_3 = arith.constant 0 : index
    %c0_4 = arith.constant 0 : index
    %3 = vector.load %arg4[%c0_3, %c0_4] : memref<256x512xf32, #tpu.memory_space<vmem>>, vector<256x512xf32>
    tpu.vector_store %arg4[%c0_3, %c0_4], %2 {strides = array<i32>} : memref<256x512xf32, #tpu.memory_space<vmem>>, vector<256x512xf32>,
    return
  }
  func.func @transform_0(%arg0: i32, %arg1: i32) -> (i32, i32) {
    %c0_i32 = arith.constant 0 : i32
    %c0_i32_0 = arith.constant 0 : i32
    return %arg0, %c0_i32 : i32, i32
  }
  func.func @transform_1(%arg0: i32, %arg1: i32) -> (i32, i32) {
    %c0_i32 = arith.constant 0 : i32
    %c0_i32_0 = arith.constant 0 : i32
    return %c0_i32, %arg1 : i32, i32
  }
  func.func @transform_2(%arg0: i32, %arg1: i32) -> (i32, i32) {
    %c0_i32 = arith.constant 0 : i32
    return %arg0, %arg1 : i32, i32
  }
}

</mosaic_0001>

<bundles_post_ra>
// kernel: tpu_custom_call.1
= control target key start
LH: loop header
LB: loop body
LE: loop exit
PB: predicated region body
PF: predicated region fallthrough
CT: control target
= control target key end

     0   :  { %v923_v7 = vmov 0.0   ;;  %vm60_vm0 = vcmask 261120   ;;  %s1226_s0 = inlined_call_operand.vmem [shape: f32[256,32], index: 0, kind: input, shape index: {}]   ;;  %s1227_s1 = inlined_call_operand.vmem [shape: f32[32,512], index: 1, kind: input, shape index: {}]   ;;  %s1228_s2 = inlined_call_operand.hbm [shape: f32[256,512], index: 2, kind: output, shape index: {}]  }
   0x1   :  { %v45_v0 = vld [vmem:[%s1227_s1 + $0x8] sm:$0xff]  ;;  %v47_v2 = vld [vmem:[%s1227_s1 + $0x18] sm:$0xff]  ;;  %v44_v5 = vld [vmem:[%s1227_s1] sm:$0xff]  ;;  %221 = vmatprep.mubr.f32.mxu0 %v923_v7  ;;  %478 = vmatprep.mubr.f32.mxu1 %v923_v7 }
   0x2   :  { %v49_v1 = vld [vmem:[%s1227_s1 + $0x28] sm:$0xff]  ;;  %v51_v4 = vld [vmem:[%s1227_s1 + $0x38] sm:$0xff]  ;;  %v48_v6 = vld [vmem:[%s1227_s1 + $0x20] sm:$0xff] }
   0x3   :  { %v879_v3 = vpack.c.bf16 %v49_v1, %v45_v0  ;;  %v887_v8 = vpack.c.bf16 %v51_v4, %v47_v2  ;;  %v881_v9 = vpack.c.bf16 %v48_v6, %v44_v5  ;;  %v46_v10 = vld [vmem:[%s1227_s1 + $0x10] sm:$0xff]  ;;  %v53_v12 = vld [vmem:[%s1227_s1 + $0x48] sm:$0xff]  ;;  %v55_v15 = vld [vmem:[%s1227_s1 + $0x58] sm:$0xff] }
   0x4   :  { %v50_v11 = vld [vmem:[%s1227_s1 + $0x30] sm:$0xff]  ;;  %v57_v14 = vld [vmem:[%s1227_s1 + $0x68] sm:$0xff]  ;;  %v59_v16 = vld [vmem:[%s1227_s1 + $0x78] sm:$0xff] }
   0x5   :  { %880 = vmatprep.subr.bf16.mxu0 %v879_v3  ;;  %v889_v13 = vpack.c.bf16 %v50_v11, %v46_v10  ;;  %888 = vmatprep.subr.bf16.mxu1 %v887_v8  ;;  %v883_v17 = vpack.c.bf16 %v57_v14, %v53_v12  ;;  %v891_v18 = vpack.c.bf16 %v59_v16, %v55_v15  ;;  %v52_v19 = vld [vmem:[%s1227_s1 + $0x40] sm:$0xff]  ;;  %v54_v21 = vld [vmem:[%s1227_s1 + $0x50] sm:$0xff]  ;;  %v13_v26 = vld [vmem:[%s1226_s0 + $0x8] sm:$0xff] }
   0x6   :  { %882 = vmatpush1.bf16.msra.mxu0 %v881_v9  ;;  %v56_v20 = vld [vmem:[%s1227_s1 + $0x60] sm:$0xff]  ;;  %v58_v23 = vld [vmem:[%s1227_s1 + $0x70] sm:$0xff] }
   0x7   :  { %890 = vmatpush1.bf16.msra.mxu1 %v889_v13  ;;  %v885_v22 = vpack.c.bf16 %v56_v20, %v52_v19  ;;  %884 = vmatprep.subr.bf16.mxu0 %v883_v17  ;;  %v893_v24 = vpack.c.bf16 %v58_v23, %v54_v21  ;;  %v12_v25 = vld [vmem:[%s1226_s0] sm:$0xff]  ;;  %v14_v27 = vld [vmem:[%s1226_s0 + $0x10] sm:$0xff] }
   0x8   :  { %892 = vmatprep.subr.bf16.mxu1 %v891_v18 }
   0xa   :  { %886 = vmatpush1.bf16.msra.mxu0 %v885_v22 }
   0xb   :  { %894 = vmatpush1.bf16.msra.mxu1 %v893_v24 }
   0xd   :  { %815 = vmatmul.mubr.msk.f32.vlgmr.msra.gmra.mrb[0].mxu0 %vm60_vm0, %v12_v25 }
   0xe   :  { %847 = vmatmul.mubr.msk.f32.vlgmr.msra.gmra.mrb[0].mxu1 %vm60_vm0, %v12_v25  ;;  %227 = vmatprep.mubr.f32.mxu0 %v923_v7 }
   0xf   :  { %484 = vmatprep.mubr.f32.mxu1 %v923_v7 }
  0x11   :  { %816 = vmatmul.mubr.msk.f32.gmra.mrb[2].mxu0 %vm60_vm0, %v13_v26 }
  0x12   :  { %848 = vmatmul.mubr.msk.f32.gmra.mrb[2].mxu1 %vm60_vm0, %v13_v26  ;;  %233 = vmatprep.mubr.f32.mxu0 %v923_v7 }
  0x13   :  { %7 = vsyncpa [#allocation3], 0  ;;  %490 = vmatprep.mubr.f32.mxu1 %v923_v7  ;;  %v15_v28 = vld [vmem:[%s1226_s0 + $0x18] sm:$0xff]  ;;  %v16_v29 = vld [vmem:[%s1226_s0 + $0x20] sm:$0xff] }
  0x14   :  { %v17_v30 = vld [vmem:[%s1226_s0 + $0x28] sm:$0xff]  ;;  %v18_v31 = vld [vmem:[%s1226_s0 + $0x30] sm:$0xff]  ;;  %v19_v32 = vld [vmem:[%s1226_s0 + $0x38] sm:$0xff] }
  0x15   :  { %817 = vmatmul.mubr.msk.f32.gmra.mrb[4].mxu0 %vm60_vm0, %v14_v27  ;;  %v20_v33 = vld [vmem:[%s1226_s0 + $0x40] sm:$0xff]  ;;  %v21_v34 = vld [vmem:[%s1226_s0 + $0x48] sm:$0xff]  ;;  %v22_v35 = vld [vmem:[%s1226_s0 + $0x50] sm:$0xff] }
  0x16   :  { %849 = vmatmul.mubr.msk.f32.gmra.mrb[4].mxu1 %vm60_vm0, %v14_v27  ;;  %239 = vmatprep.mubr.f32.mxu0 %v923_v7  ;;  %v23_v36 = vld [vmem:[%s1226_s0 + $0x58] sm:$0xff]  ;;  %v24_v37 = vld [vmem:[%s1226_s0 + $0x60] sm:$0xff]  ;;  %v25_v38 = vld [vmem:[%s1226_s0 + $0x68] sm:$0xff] }
  0x17   :  { %496 = vmatprep.mubr.f32.mxu1 %v923_v7  ;;  %v26_v39 = vld [vmem:[%s1226_s0 + $0x70] sm:$0xff]  ;;  %v27_v40 = vld [vmem:[%s1226_s0 + $0x78] sm:$0xff]  ;;  %v28_v41 = vld [vmem:[%s1226_s0 + $0x80] sm:$0xff] }
  0x18   :  { %v29_v42 = vld [vmem:[%s1226_s0 + $0x88] sm:$0xff]  ;;  %v30_v43 = vld [vmem:[%s1226_s0 + $0x90] sm:$0xff]  ;;  %v31_v44 = vld [vmem:[%s1226_s0 + $0x98] sm:$0xff] }
  0x19   :  { %818 = vmatmul.mubr.msk.f32.gmra.mrb[6].mxu0 %vm60_vm0, %v15_v28  ;;  %v32_v45 = vld [vmem:[%s1226_s0 + $0xa0] sm:$0xff]  ;;  %v33_v46 = vld [vmem:[%s1226_s0 + $0xa8] sm:$0xff]  ;;  %v34_v47 = vld [vmem:[%s1226_s0 + $0xb0] sm:$0xff] }
  0x1a   :  { %850 = vmatmul.mubr.msk.f32.gmra.mrb[6].mxu1 %vm60_vm0, %v15_v28  ;;  %245 = vmatprep.mubr.f32.mxu0 %v923_v7  ;;  %v35_v48 = vld [vmem:[%s1226_s0 + $0xb8] sm:$0xff]  ;;  %v36_v49 = vld [vmem:[%s1226_s0 + $0xc0] sm:$0xff]  ;;  %v37_v50 = vld [vmem:[%s1226_s0 + $0xc8] sm:$0xff] }
  0x1b   :  { %502 = vmatprep.mubr.f32.mxu1 %v923_v7  ;;  %v38_v51 = vld [vmem:[%s1226_s0 + $0xd0] sm:$0xff]  ;;  %v39_v52 = vld [vmem:[%s1226_s0 + $0xd8] sm:$0xff]  ;;  %v40_v53 = vld [vmem:[%s1226_s0 + $0xe0] sm:$0xff] }
  0x1c   :  { %v41_v54 = vld [vmem:[%s1226_s0 + $0xe8] sm:$0xff]  ;;  %v42_v55 = vld [vmem:[%s1226_s0 + $0xf0] sm:$0xff]  ;;  %v43_v56 = vld [vmem:[%s1226_s0 + $0xf8] sm:$0xff]  ;;  %s924_s0 = smov [#allocation2]  }
  0x1d   :  { %819 = vmatmul.mubr.msk.f32.gmra.mrb[8].mxu0 %vm60_vm0, %v16_v29  ;;  %s804_s18 = sshll.u32 %s924_s0, 4  ;;  %s805_s18 = int_to_ptr.vmem [resolvable:$true] %s804_s18 }
  0x1e   :  { %851 = vmatmul.mubr.msk.f32.gmra.mrb[8].mxu1 %vm60_vm0, %v16_v29  ;;  %251 = vmatprep.mubr.f32.mxu0 %v923_v7  ;;  %s899_s19 = scalar_lea.vmem %s805_s18, 16384  ;;  %p904_p1 = scmp.lt.s32.totalorder %s805_s18, %s805_s18 }
  0x1f   :  { %508 = vmatprep.mubr.f32.mxu1 %v923_v7  ;;  %p900_p0 = scmp.ne.s32.totalorder %s805_s18, %s899_s19  ;;  %p905_p2 = scmp.lt.s32.totalorder %s899_s19, %s899_s19 }
  0x21   :  { %820 = vmatmul.mubr.msk.f32.gmra.mrb[10].mxu0 %vm60_vm0, %v17_v30  ;;  %p906_p3 = por %p905_p2, %p904_p1 }
  0x22   :  { %852 = vmatmul.mubr.msk.f32.gmra.mrb[10].mxu1 %vm60_vm0, %v17_v30  ;;  %257 = vmatprep.mubr.f32.mxu0 %v923_v7 }
  0x23   :  { %514 = vmatprep.mubr.f32.mxu1 %v923_v7  ;;  %p907_p4 = pnand %p906_p3, %p900_p0 }
  0x25   :  { %821 = vmatmul.mubr.msk.f32.gmra.mrb[12].mxu0 %vm60_vm0, %v18_v31 }
  0x26   :  { %853 = vmatmul.mubr.msk.f32.gmra.mrb[12].mxu1 %vm60_vm0, %v18_v31  ;;  %263 = vmatprep.mubr.f32.mxu0 %v923_v7 }
  0x27   :  { %520 = vmatprep.mubr.f32.mxu1 %v923_v7 }
  0x29   :  { %822 = vmatmul.mubr.msk.f32.gmra.mrb[14].mxu0 %vm60_vm0, %v19_v32 }
  0x2a   :  { %854 = vmatmul.mubr.msk.f32.gmra.mrb[14].mxu1 %vm60_vm0, %v19_v32  ;;  %269 = vmatprep.mubr.f32.mxu0 %v923_v7 }
  0x2b   :  { %526 = vmatprep.mubr.f32.mxu1 %v923_v7 }
  0x2d   :  { %823 = vmatmul.mubr.msk.f32.gmra.mrb[16].mxu0 %vm60_vm0, %v20_v33 }
  0x2e   :  { %855 = vmatmul.mubr.msk.f32.gmra.mrb[16].mxu1 %vm60_vm0, %v20_v33  ;;  %275 = vmatprep.mubr.f32.mxu0 %v923_v7 }
  0x2f   :  { %532 = vmatprep.mubr.f32.mxu1 %v923_v7 }
  0x31   :  { %824 = vmatmul.mubr.msk.f32.gmra.mrb[18].mxu0 %vm60_vm0, %v21_v34 }
  0x32   :  { %856 = vmatmul.mubr.msk.f32.gmra.mrb[18].mxu1 %vm60_vm0, %v21_v34  ;;  %281 = vmatprep.mubr.f32.mxu0 %v923_v7 }
  0x33   :  { %538 = vmatprep.mubr.f32.mxu1 %v923_v7 }
  0x35   :  { %825 = vmatmul.mubr.msk.f32.gmra.mrb[20].mxu0 %vm60_vm0, %v22_v35 }
  0x36   :  { %857 = vmatmul.mubr.msk.f32.gmra.mrb[20].mxu1 %vm60_vm0, %v22_v35  ;;  %287 = vmatprep.mubr.f32.mxu0 %v923_v7 }
  0x37   :  { %544 = vmatprep.mubr.f32.mxu1 %v923_v7 }
  0x39   :  { %826 = vmatmul.mubr.msk.f32.gmra.mrb[22].mxu0 %vm60_vm0, %v23_v36 }
  0x3a   :  { %858 = vmatmul.mubr.msk.f32.gmra.mrb[22].mxu1 %vm60_vm0, %v23_v36  ;;  %293 = vmatprep.mubr.f32.mxu0 %v923_v7 }
  0x3b   :  { %550 = vmatprep.mubr.f32.mxu1 %v923_v7 }
  0x3d   :  { %827 = vmatmul.mubr.msk.f32.gmra.mrb[24].mxu0 %vm60_vm0, %v24_v37 }
  0x3e   :  { %859 = vmatmul.mubr.msk.f32.gmra.mrb[24].mxu1 %vm60_vm0, %v24_v37  ;;  %299 = vmatprep.mubr.f32.mxu0 %v923_v7 }
  0x3f   :  { %556 = vmatprep.mubr.f32.mxu1 %v923_v7 }
  0x41   :  { %828 = vmatmul.mubr.msk.f32.gmra.mrb[26].mxu0 %vm60_vm0, %v25_v38 }
  0x42   :  { %860 = vmatmul.mubr.msk.f32.gmra.mrb[26].mxu1 %vm60_vm0, %v25_v38  ;;  %305 = vmatprep.mubr.f32.mxu0 %v923_v7 }
  0x43   :  { %562 = vmatprep.mubr.f32.mxu1 %v923_v7 }
  0x45   :  { %829 = vmatmul.mubr.msk.f32.gmra.mrb[28].mxu0 %vm60_vm0, %v26_v39 }
  0x46   :  { %861 = vmatmul.mubr.msk.f32.gmra.mrb[28].mxu1 %vm60_vm0, %v26_v39  ;;  %311 = vmatprep.mubr.f32.mxu0 %v923_v7 }
  0x47   :  { %568 = vmatprep.mubr.f32.mxu1 %v923_v7 }
  0x49   :  { %830 = vmatmul.mubr.msk.f32.gmra.mrb[30].mxu0 %vm60_vm0, %v27_v40 }
  0x4a   :  { %862 = vmatmul.mubr.msk.f32.gmra.mrb[30].mxu1 %vm60_vm0, %v27_v40  ;;  %317 = vmatprep.mubr.f32.mxu0 %v923_v7 }
  0x4b   :  { %574 = vmatprep.mubr.f32.mxu1 %v923_v7 }
  0x4d   :  { %831 = vmatmul.mubr.msk.f32.gmra.mrb[32].mxu0 %vm60_vm0, %v28_v41 }
  0x4e   :  { %863 = vmatmul.mubr.msk.f32.gmra.mrb[32].mxu1 %vm60_vm0, %v28_v41  ;;  %323 = vmatprep.mubr.f32.mxu0 %v923_v7 }
  0x4f   :  { %580 = vmatprep.mubr.f32.mxu1 %v923_v7 }
  0x51   :  { %832 = vmatmul.mubr.msk.f32.gmra.mrb[34].mxu0 %vm60_vm0, %v29_v42 }
  0x52   :  { %864 = vmatmul.mubr.msk.f32.gmra.mrb[34].mxu1 %vm60_vm0, %v29_v42  ;;  %329 = vmatprep.mubr.f32.mxu0 %v923_v7 }
  0x53   :  { %586 = vmatprep.mubr.f32.mxu1 %v923_v7 }
  0x55   :  { %833 = vmatmul.mubr.msk.f32.gmra.mrb[36].mxu0 %vm60_vm0, %v30_v43 }
  0x56   :  { %865 = vmatmul.mubr.msk.f32.gmra.mrb[36].mxu1 %vm60_vm0, %v30_v43  ;;  %335 = vmatprep.mubr.f32.mxu0 %v923_v7 }
  0x57   :  { %592 = vmatprep.mubr.f32.mxu1 %v923_v7 }
  0x59   :  { %834 = vmatmul.mubr.msk.f32.gmra.mrb[38].mxu0 %vm60_vm0, %v31_v44 }
  0x5a   :  { %866 = vmatmul.mubr.msk.f32.gmra.mrb[38].mxu1 %vm60_vm0, %v31_v44  ;;  %341 = vmatprep.mubr.f32.mxu0 %v923_v7 }
  0x5b   :  { %598 = vmatprep.mubr.f32.mxu1 %v923_v7 }
  0x5d   :  { %835 = vmatmul.mubr.msk.f32.gmra.mrb[40].mxu0 %vm60_vm0, %v32_v45 }
  0x5e   :  { %867 = vmatmul.mubr.msk.f32.gmra.mrb[40].mxu1 %vm60_vm0, %v32_v45  ;;  %347 = vmatprep.mubr.f32.mxu0 %v923_v7 }
  0x5f   :  { %604 = vmatprep.mubr.f32.mxu1 %v923_v7 }
  0x61   :  { %836 = vmatmul.mubr.msk.f32.gmra.mrb[42].mxu0 %vm60_vm0, %v33_v46 }
  0x62   :  { %868 = vmatmul.mubr.msk.f32.gmra.mrb[42].mxu1 %vm60_vm0, %v33_v46  ;;  %353 = vmatprep.mubr.f32.mxu0 %v923_v7 }
  0x63   :  { %610 = vmatprep.mubr.f32.mxu1 %v923_v7 }
  0x65   :  { %837 = vmatmul.mubr.msk.f32.gmra.mrb[44].mxu0 %vm60_vm0, %v34_v47 }
  0x66   :  { %869 = vmatmul.mubr.msk.f32.gmra.mrb[44].mxu1 %vm60_vm0, %v34_v47  ;;  %359 = vmatprep.mubr.f32.mxu0 %v923_v7 }
  0x67   :  { %616 = vmatprep.mubr.f32.mxu1 %v923_v7 }
  0x69   :  { %838 = vmatmul.mubr.msk.f32.gmra.mrb[46].mxu0 %vm60_vm0, %v35_v48 }
  0x6a   :  { %870 = vmatmul.mubr.msk.f32.gmra.mrb[46].mxu1 %vm60_vm0, %v35_v48  ;;  %365 = vmatprep.mubr.f32.mxu0 %v923_v7 }
  0x6b   :  { %622 = vmatprep.mubr.f32.mxu1 %v923_v7 }
  0x6d   :  { %839 = vmatmul.mubr.msk.f32.gmra.mrb[48].mxu0 %vm60_vm0, %v36_v49 }
  0x6e   :  { %871 = vmatmul.mubr.msk.f32.gmra.mrb[48].mxu1 %vm60_vm0, %v36_v49  ;;  %371 = vmatprep.mubr.f32.mxu0 %v923_v7 }
  0x6f   :  { %628 = vmatprep.mubr.f32.mxu1 %v923_v7 }
  0x71   :  { %840 = vmatmul.mubr.msk.f32.gmra.mrb[50].mxu0 %vm60_vm0, %v37_v50 }
  0x72   :  { %872 = vmatmul.mubr.msk.f32.gmra.mrb[50].mxu1 %vm60_vm0, %v37_v50  ;;  %377 = vmatprep.mubr.f32.mxu0 %v923_v7 }
  0x73   :  { %634 = vmatprep.mubr.f32.mxu1 %v923_v7 }
  0x75   :  { %841 = vmatmul.mubr.msk.f32.gmra.mrb[52].mxu0 %vm60_vm0, %v38_v51 }
  0x76   :  { %873 = vmatmul.mubr.msk.f32.gmra.mrb[52].mxu1 %vm60_vm0, %v38_v51  ;;  %383 = vmatprep.mubr.f32.mxu0 %v923_v7 }
  0x77   :  { %640 = vmatprep.mubr.f32.mxu1 %v923_v7 }
  0x79   :  { %842 = vmatmul.mubr.msk.f32.gmra.mrb[54].mxu0 %vm60_vm0, %v39_v52 }
  0x7a   :  { %874 = vmatmul.mubr.msk.f32.gmra.mrb[54].mxu1 %vm60_vm0, %v39_v52  ;;  %389 = vmatprep.mubr.f32.mxu0 %v923_v7 }
  0x7b   :  { %646 = vmatprep.mubr.f32.mxu1 %v923_v7 }
  0x7d   :  { %843 = vmatmul.mubr.msk.f32.gmra.mrb[56].mxu0 %vm60_vm0, %v40_v53 }
  0x7e   :  { %875 = vmatmul.mubr.msk.f32.gmra.mrb[56].mxu1 %vm60_vm0, %v40_v53  ;;  %395 = vmatprep.mubr.f32.mxu0 %v923_v7 }
  0x7f   :  { %652 = vmatprep.mubr.f32.mxu1 %v923_v7 }
  0x81   :  { %844 = vmatmul.mubr.msk.f32.gmra.mrb[58].mxu0 %vm60_vm0, %v41_v54 }
  0x82   :  { %876 = vmatmul.mubr.msk.f32.gmra.mrb[58].mxu1 %vm60_vm0, %v41_v54  ;;  %401 = vmatprep.mubr.f32.mxu0 %v923_v7 }
  0x83   :  { %658 = vmatprep.mubr.f32.mxu1 %v923_v7 }
  0x85   :  { %845 = vmatmul.mubr.msk.f32.gmra.mrb[60].mxu0 %vm60_vm0, %v42_v55 }
  0x86   :  { %877 = vmatmul.mubr.msk.f32.gmra.mrb[60].mxu1 %vm60_vm0, %v42_v55  ;;  %407 = vmatprep.mubr.f32.mxu0 %v923_v7 }
  0x87   :  { %664 = vmatprep.mubr.f32.mxu1 %v923_v7 }
  0x89   :  { %846 = vmatmul.mubr.msk.f32.gmra.mrb[62].mxu0 %vm60_vm0, %v43_v56 }
  0x8a   :  { %878 = vmatmul.mubr.msk.f32.gmra.mrb[62].mxu1 %vm60_vm0, %v43_v56 }
  0xe0   :  { %v223_v57 = vpop.f32.mrb[0].mxu0 }
  0xe1   :  { %671 = vst [vmem:[#allocation2] sm:$0xff] %v223_v57  ;;  %v480_v58 = vpop.f32.mrb[0].mxu1  ;;  %v225_v59 = vpop.f32.mrb[1].mxu0 }
  0xe2   :  { %673 = vst [vmem:[#allocation2 + $0x10] sm:$0xff] %v480_v58  ;;  %672 = vst [vmem:[#allocation2 + $0x8] sm:$0xff] %v225_v59  ;;  %v482_v60 = vpop.f32.mrb[1].mxu1 }
  0xe3   :  { %674 = vst [vmem:[#allocation2 + $0x18] sm:$0xff] %v482_v60 }
  0xe4   :  { %v229_v61 = vpop.f32.mrb[2].mxu0 }
  0xe5   :  { %675 = vst [vmem:[#allocation2 + $0x20] sm:$0xff] %v229_v61  ;;  %v486_v62 = vpop.f32.mrb[2].mxu1  ;;  %v231_v63 = vpop.f32.mrb[3].mxu0 }
  0xe6   :  { %677 = vst [vmem:[#allocation2 + $0x30] sm:$0xff] %v486_v62  ;;  %676 = vst [vmem:[#allocation2 + $0x28] sm:$0xff] %v231_v63  ;;  %v488_v0 = vpop.f32.mrb[3].mxu1 }
  0xe7   :  { %678 = vst [vmem:[#allocation2 + $0x38] sm:$0xff] %v488_v0 }
  0xe8   :  { %v235_v1 = vpop.f32.mrb[4].mxu0 }
  0xe9   :  { %679 = vst [vmem:[#allocation2 + $0x40] sm:$0xff] %v235_v1  ;;  %v492_v2 = vpop.f32.mrb[4].mxu1  ;;  %v237_v3 = vpop.f32.mrb[5].mxu0 }
  0xea   :  { %681 = vst [vmem:[#allocation2 + $0x50] sm:$0xff] %v492_v2  ;;  %680 = vst [vmem:[#allocation2 + $0x48] sm:$0xff] %v237_v3  ;;  %v494_v4 = vpop.f32.mrb[5].mxu1 }
  0xeb   :  { %682 = vst [vmem:[#allocation2 + $0x58] sm:$0xff] %v494_v4 }
  0xec   :  { %v241_v5 = vpop.f32.mrb[6].mxu0 }
  0xed   :  { %683 = vst [vmem:[#allocation2 + $0x60] sm:$0xff] %v241_v5  ;;  %v498_v6 = vpop.f32.mrb[6].mxu1  ;;  %v243_v7 = vpop.f32.mrb[7].mxu0 }
  0xee   :  { %685 = vst [vmem:[#allocation2 + $0x70] sm:$0xff] %v498_v6  ;;  %684 = vst [vmem:[#allocation2 + $0x68] sm:$0xff] %v243_v7  ;;  %v500_v8 = vpop.f32.mrb[7].mxu1 }
  0xef   :  { %686 = vst [vmem:[#allocation2 + $0x78] sm:$0xff] %v500_v8 }
  0xf0   :  { %v247_v9 = vpop.f32.mrb[8].mxu0 }
  0xf1   :  { %687 = vst [vmem:[#allocation2 + $0x80] sm:$0xff] %v247_v9  ;;  %v504_v10 = vpop.f32.mrb[8].mxu1  ;;  %v249_v11 = vpop.f32.mrb[9].mxu0 }
  0xf2   :  { %689 = vst [vmem:[#allocation2 + $0x90] sm:$0xff] %v504_v10  ;;  %688 = vst [vmem:[#allocation2 + $0x88] sm:$0xff] %v249_v11  ;;  %v506_v12 = vpop.f32.mrb[9].mxu1 }
  0xf3   :  { %690 = vst [vmem:[#allocation2 + $0x98] sm:$0xff] %v506_v12 }
  0xf4   :  { %v253_v13 = vpop.f32.mrb[10].mxu0 }
  0xf5   :  { %691 = vst [vmem:[#allocation2 + $0xa0] sm:$0xff] %v253_v13  ;;  %v510_v14 = vpop.f32.mrb[10].mxu1  ;;  %v255_v15 = vpop.f32.mrb[11].mxu0 }
  0xf6   :  { %693 = vst [vmem:[#allocation2 + $0xb0] sm:$0xff] %v510_v14  ;;  %692 = vst [vmem:[#allocation2 + $0xa8] sm:$0xff] %v255_v15  ;;  %v512_v16 = vpop.f32.mrb[11].mxu1 }
  0xf7   :  { %694 = vst [vmem:[#allocation2 + $0xb8] sm:$0xff] %v512_v16 }
  0xf8   :  { %v259_v17 = vpop.f32.mrb[12].mxu0 }
  0xf9   :  { %695 = vst [vmem:[#allocation2 + $0xc0] sm:$0xff] %v259_v17  ;;  %v516_v18 = vpop.f32.mrb[12].mxu1  ;;  %v261_v19 = vpop.f32.mrb[13].mxu0 }
  0xfa   :  { %697 = vst [vmem:[#allocation2 + $0xd0] sm:$0xff] %v516_v18  ;;  %696 = vst [vmem:[#allocation2 + $0xc8] sm:$0xff] %v261_v19  ;;  %v518_v20 = vpop.f32.mrb[13].mxu1 }
  0xfb   :  { %698 = vst [vmem:[#allocation2 + $0xd8] sm:$0xff] %v518_v20 }
  0xfc   :  { %v265_v21 = vpop.f32.mrb[14].mxu0 }
  0xfd   :  { %699 = vst [vmem:[#allocation2 + $0xe0] sm:$0xff] %v265_v21  ;;  %v522_v22 = vpop.f32.mrb[14].mxu1  ;;  %v267_v23 = vpop.f32.mrb[15].mxu0 }
  0xfe   :  { %701 = vst [vmem:[#allocation2 + $0xf0] sm:$0xff] %v522_v22  ;;  %700 = vst [vmem:[#allocation2 + $0xe8] sm:$0xff] %v267_v23  ;;  %v524_v24 = vpop.f32.mrb[15].mxu1 }
  0xff   :  { %702 = vst [vmem:[#allocation2 + $0xf8] sm:$0xff] %v524_v24 }
 0x100   :  { %v271_v25 = vpop.f32.mrb[16].mxu0 }
 0x101   :  { %703 = vst [vmem:[#allocation2 + $0x100] sm:$0xff] %v271_v25  ;;  %v528_v26 = vpop.f32.mrb[16].mxu1  ;;  %v273_v27 = vpop.f32.mrb[17].mxu0 }
 0x102   :  { %705 = vst [vmem:[#allocation2 + $0x110] sm:$0xff] %v528_v26  ;;  %704 = vst [vmem:[#allocation2 + $0x108] sm:$0xff] %v273_v27  ;;  %v530_v28 = vpop.f32.mrb[17].mxu1 }
 0x103   :  { %706 = vst [vmem:[#allocation2 + $0x118] sm:$0xff] %v530_v28 }
 0x104   :  { %v277_v29 = vpop.f32.mrb[18].mxu0 }
 0x105   :  { %707 = vst [vmem:[#allocation2 + $0x120] sm:$0xff] %v277_v29  ;;  %v534_v30 = vpop.f32.mrb[18].mxu1  ;;  %v279_v31 = vpop.f32.mrb[19].mxu0 }
 0x106   :  { %709 = vst [vmem:[#allocation2 + $0x130] sm:$0xff] %v534_v30  ;;  %708 = vst [vmem:[#allocation2 + $0x128] sm:$0xff] %v279_v31  ;;  %v536_v32 = vpop.f32.mrb[19].mxu1 }
 0x107   :  { %710 = vst [vmem:[#allocation2 + $0x138] sm:$0xff] %v536_v32 }
 0x108   :  { %v283_v33 = vpop.f32.mrb[20].mxu0 }
 0x109   :  { %711 = vst [vmem:[#allocation2 + $0x140] sm:$0xff] %v283_v33  ;;  %v540_v34 = vpop.f32.mrb[20].mxu1  ;;  %v285_v35 = vpop.f32.mrb[21].mxu0 }
 0x10a   :  { %713 = vst [vmem:[#allocation2 + $0x150] sm:$0xff] %v540_v34  ;;  %712 = vst [vmem:[#allocation2 + $0x148] sm:$0xff] %v285_v35  ;;  %v542_v36 = vpop.f32.mrb[21].mxu1 }
 0x10b   :  { %714 = vst [vmem:[#allocation2 + $0x158] sm:$0xff] %v542_v36 }
 0x10c   :  { %v289_v37 = vpop.f32.mrb[22].mxu0 }
 0x10d   :  { %715 = vst [vmem:[#allocation2 + $0x160] sm:$0xff] %v289_v37  ;;  %v546_v38 = vpop.f32.mrb[22].mxu1  ;;  %v291_v39 = vpop.f32.mrb[23].mxu0 }
 0x10e   :  { %717 = vst [vmem:[#allocation2 + $0x170] sm:$0xff] %v546_v38  ;;  %716 = vst [vmem:[#allocation2 + $0x168] sm:$0xff] %v291_v39  ;;  %v548_v40 = vpop.f32.mrb[23].mxu1 }
 0x10f   :  { %718 = vst [vmem:[#allocation2 + $0x178] sm:$0xff] %v548_v40 }
 0x110   :  { %v295_v41 = vpop.f32.mrb[24].mxu0 }
 0x111   :  { %719 = vst [vmem:[#allocation2 + $0x180] sm:$0xff] %v295_v41  ;;  %v552_v42 = vpop.f32.mrb[24].mxu1  ;;  %v297_v43 = vpop.f32.mrb[25].mxu0 }
 0x112   :  { %721 = vst [vmem:[#allocation2 + $0x190] sm:$0xff] %v552_v42  ;;  %720 = vst [vmem:[#allocation2 + $0x188] sm:$0xff] %v297_v43  ;;  %v554_v44 = vpop.f32.mrb[25].mxu1 }
 0x113   :  { %722 = vst [vmem:[#allocation2 + $0x198] sm:$0xff] %v554_v44 }
 0x114   :  { %v301_v45 = vpop.f32.mrb[26].mxu0 }
 0x115   :  { %723 = vst [vmem:[#allocation2 + $0x1a0] sm:$0xff] %v301_v45  ;;  %v558_v46 = vpop.f32.mrb[26].mxu1  ;;  %v303_v47 = vpop.f32.mrb[27].mxu0 }
 0x116   :  { %725 = vst [vmem:[#allocation2 + $0x1b0] sm:$0xff] %v558_v46  ;;  %724 = vst [vmem:[#allocation2 + $0x1a8] sm:$0xff] %v303_v47  ;;  %v560_v48 = vpop.f32.mrb[27].mxu1 }
 0x117   :  { %726 = vst [vmem:[#allocation2 + $0x1b8] sm:$0xff] %v560_v48 }
 0x118   :  { %v307_v49 = vpop.f32.mrb[28].mxu0 }
 0x119   :  { %727 = vst [vmem:[#allocation2 + $0x1c0] sm:$0xff] %v307_v49  ;;  %v564_v50 = vpop.f32.mrb[28].mxu1  ;;  %v309_v51 = vpop.f32.mrb[29].mxu0 }
 0x11a   :  { %729 = vst [vmem:[#allocation2 + $0x1d0] sm:$0xff] %v564_v50  ;;  %728 = vst [vmem:[#allocation2 + $0x1c8] sm:$0xff] %v309_v51  ;;  %v566_v52 = vpop.f32.mrb[29].mxu1 }
 0x11b   :  { %730 = vst [vmem:[#allocation2 + $0x1d8] sm:$0xff] %v566_v52 }
 0x11c   :  { %v313_v53 = vpop.f32.mrb[30].mxu0 }
 0x11d   :  { %731 = vst [vmem:[#allocation2 + $0x1e0] sm:$0xff] %v313_v53  ;;  %v570_v54 = vpop.f32.mrb[30].mxu1  ;;  %v315_v55 = vpop.f32.mrb[31].mxu0 }
 0x11e   :  { %733 = vst [vmem:[#allocation2 + $0x1f0] sm:$0xff] %v570_v54  ;;  %732 = vst [vmem:[#allocation2 + $0x1e8] sm:$0xff] %v315_v55  ;;  %v572_v56 = vpop.f32.mrb[31].mxu1 }
 0x11f   :  { %734 = vst [vmem:[#allocation2 + $0x1f8] sm:$0xff] %v572_v56 }
 0x120   :  { %v319_v57 = vpop.f32.mrb[32].mxu0 }
 0x121   :  { %735 = vst [vmem:[#allocation2 + $0x200] sm:$0xff] %v319_v57  ;;  %v576_v58 = vpop.f32.mrb[32].mxu1  ;;  %v321_v59 = vpop.f32.mrb[33].mxu0 }
 0x122   :  { %737 = vst [vmem:[#allocation2 + $0x210] sm:$0xff] %v576_v58  ;;  %736 = vst [vmem:[#allocation2 + $0x208] sm:$0xff] %v321_v59  ;;  %v578_v60 = vpop.f32.mrb[33].mxu1 }
 0x123   :  { %738 = vst [vmem:[#allocation2 + $0x218] sm:$0xff] %v578_v60 }
 0x124   :  { %v325_v61 = vpop.f32.mrb[34].mxu0 }
 0x125   :  { %739 = vst [vmem:[#allocation2 + $0x220] sm:$0xff] %v325_v61  ;;  %v582_v62 = vpop.f32.mrb[34].mxu1  ;;  %v327_v63 = vpop.f32.mrb[35].mxu0 }
 0x126   :  { %741 = vst [vmem:[#allocation2 + $0x230] sm:$0xff] %v582_v62  ;;  %740 = vst [vmem:[#allocation2 + $0x228] sm:$0xff] %v327_v63  ;;  %v584_v0 = vpop.f32.mrb[35].mxu1 }
 0x127   :  { %742 = vst [vmem:[#allocation2 + $0x238] sm:$0xff] %v584_v0 }
 0x128   :  { %v331_v1 = vpop.f32.mrb[36].mxu0 }
 0x129   :  { %743 = vst [vmem:[#allocation2 + $0x240] sm:$0xff] %v331_v1  ;;  %v588_v2 = vpop.f32.mrb[36].mxu1  ;;  %v333_v3 = vpop.f32.mrb[37].mxu0 }
 0x12a   :  { %745 = vst [vmem:[#allocation2 + $0x250] sm:$0xff] %v588_v2  ;;  %744 = vst [vmem:[#allocation2 + $0x248] sm:$0xff] %v333_v3  ;;  %v590_v4 = vpop.f32.mrb[37].mxu1 }
 0x12b   :  { %746 = vst [vmem:[#allocation2 + $0x258] sm:$0xff] %v590_v4 }
 0x12c   :  { %v337_v5 = vpop.f32.mrb[38].mxu0 }
 0x12d   :  { %747 = vst [vmem:[#allocation2 + $0x260] sm:$0xff] %v337_v5  ;;  %v594_v6 = vpop.f32.mrb[38].mxu1  ;;  %v339_v7 = vpop.f32.mrb[39].mxu0 }
 0x12e   :  { %749 = vst [vmem:[#allocation2 + $0x270] sm:$0xff] %v594_v6  ;;  %748 = vst [vmem:[#allocation2 + $0x268] sm:$0xff] %v339_v7  ;;  %v596_v8 = vpop.f32.mrb[39].mxu1 }
 0x12f   :  { %750 = vst [vmem:[#allocation2 + $0x278] sm:$0xff] %v596_v8 }
 0x130   :  { %v343_v9 = vpop.f32.mrb[40].mxu0 }
 0x131   :  { %751 = vst [vmem:[#allocation2 + $0x280] sm:$0xff] %v343_v9  ;;  %v600_v10 = vpop.f32.mrb[40].mxu1  ;;  %v345_v11 = vpop.f32.mrb[41].mxu0 }
 0x132   :  { %753 = vst [vmem:[#allocation2 + $0x290] sm:$0xff] %v600_v10  ;;  %752 = vst [vmem:[#allocation2 + $0x288] sm:$0xff] %v345_v11  ;;  %v602_v12 = vpop.f32.mrb[41].mxu1 }
 0x133   :  { %754 = vst [vmem:[#allocation2 + $0x298] sm:$0xff] %v602_v12 }
 0x134   :  { %v349_v13 = vpop.f32.mrb[42].mxu0 }
 0x135   :  { %755 = vst [vmem:[#allocation2 + $0x2a0] sm:$0xff] %v349_v13  ;;  %v606_v14 = vpop.f32.mrb[42].mxu1  ;;  %v351_v15 = vpop.f32.mrb[43].mxu0 }
 0x136   :  { %757 = vst [vmem:[#allocation2 + $0x2b0] sm:$0xff] %v606_v14  ;;  %756 = vst [vmem:[#allocation2 + $0x2a8] sm:$0xff] %v351_v15  ;;  %v608_v16 = vpop.f32.mrb[43].mxu1 }
 0x137   :  { %758 = vst [vmem:[#allocation2 + $0x2b8] sm:$0xff] %v608_v16 }
 0x138   :  { %v355_v17 = vpop.f32.mrb[44].mxu0 }
 0x139   :  { %759 = vst [vmem:[#allocation2 + $0x2c0] sm:$0xff] %v355_v17  ;;  %v612_v18 = vpop.f32.mrb[44].mxu1  ;;  %v357_v19 = vpop.f32.mrb[45].mxu0 }
 0x13a   :  { %761 = vst [vmem:[#allocation2 + $0x2d0] sm:$0xff] %v612_v18  ;;  %760 = vst [vmem:[#allocation2 + $0x2c8] sm:$0xff] %v357_v19  ;;  %v614_v20 = vpop.f32.mrb[45].mxu1 }
 0x13b   :  { %762 = vst [vmem:[#allocation2 + $0x2d8] sm:$0xff] %v614_v20 }
 0x13c   :  { %v361_v21 = vpop.f32.mrb[46].mxu0 }
 0x13d   :  { %763 = vst [vmem:[#allocation2 + $0x2e0] sm:$0xff] %v361_v21  ;;  %v618_v22 = vpop.f32.mrb[46].mxu1  ;;  %v363_v23 = vpop.f32.mrb[47].mxu0 }
 0x13e   :  { %765 = vst [vmem:[#allocation2 + $0x2f0] sm:$0xff] %v618_v22  ;;  %764 = vst [vmem:[#allocation2 + $0x2e8] sm:$0xff] %v363_v23  ;;  %v620_v24 = vpop.f32.mrb[47].mxu1 }
 0x13f   :  { %766 = vst [vmem:[#allocation2 + $0x2f8] sm:$0xff] %v620_v24 }
 0x140   :  { %v367_v25 = vpop.f32.mrb[48].mxu0 }
 0x141   :  { %767 = vst [vmem:[#allocation2 + $0x300] sm:$0xff] %v367_v25  ;;  %v624_v26 = vpop.f32.mrb[48].mxu1  ;;  %v369_v27 = vpop.f32.mrb[49].mxu0 }
 0x142   :  { %769 = vst [vmem:[#allocation2 + $0x310] sm:$0xff] %v624_v26  ;;  %768 = vst [vmem:[#allocation2 + $0x308] sm:$0xff] %v369_v27  ;;  %v626_v28 = vpop.f32.mrb[49].mxu1 }
 0x143   :  { %770 = vst [vmem:[#allocation2 + $0x318] sm:$0xff] %v626_v28 }
 0x144   :  { %v373_v29 = vpop.f32.mrb[50].mxu0 }
 0x145   :  { %771 = vst [vmem:[#allocation2 + $0x320] sm:$0xff] %v373_v29  ;;  %v630_v30 = vpop.f32.mrb[50].mxu1  ;;  %v375_v31 = vpop.f32.mrb[51].mxu0 }
 0x146   :  { %773 = vst [vmem:[#allocation2 + $0x330] sm:$0xff] %v630_v30  ;;  %772 = vst [vmem:[#allocation2 + $0x328] sm:$0xff] %v375_v31  ;;  %v632_v32 = vpop.f32.mrb[51].mxu1 }
 0x147   :  { %774 = vst [vmem:[#allocation2 + $0x338] sm:$0xff] %v632_v32 }
 0x148   :  { %v379_v33 = vpop.f32.mrb[52].mxu0 }
 0x149   :  { %775 = vst [vmem:[#allocation2 + $0x340] sm:$0xff] %v379_v33  ;;  %v636_v34 = vpop.f32.mrb[52].mxu1  ;;  %v381_v35 = vpop.f32.mrb[53].mxu0 }
 0x14a   :  { %777 = vst [vmem:[#allocation2 + $0x350] sm:$0xff] %v636_v34  ;;  %776 = vst [vmem:[#allocation2 + $0x348] sm:$0xff] %v381_v35  ;;  %v638_v36 = vpop.f32.mrb[53].mxu1 }
 0x14b   :  { %778 = vst [vmem:[#allocation2 + $0x358] sm:$0xff] %v638_v36 }
 0x14c   :  { %v385_v37 = vpop.f32.mrb[54].mxu0 }
 0x14d   :  { %779 = vst [vmem:[#allocation2 + $0x360] sm:$0xff] %v385_v37  ;;  %v642_v38 = vpop.f32.mrb[54].mxu1  ;;  %v387_v39 = vpop.f32.mrb[55].mxu0 }
 0x14e   :  { %781 = vst [vmem:[#allocation2 + $0x370] sm:$0xff] %v642_v38  ;;  %780 = vst [vmem:[#allocation2 + $0x368] sm:$0xff] %v387_v39  ;;  %v644_v40 = vpop.f32.mrb[55].mxu1 }
 0x14f   :  { %782 = vst [vmem:[#allocation2 + $0x378] sm:$0xff] %v644_v40 }
 0x150   :  { %v391_v41 = vpop.f32.mrb[56].mxu0 }
 0x151   :  { %783 = vst [vmem:[#allocation2 + $0x380] sm:$0xff] %v391_v41  ;;  %v648_v42 = vpop.f32.mrb[56].mxu1  ;;  %v393_v43 = vpop.f32.mrb[57].mxu0 }
 0x152   :  { %785 = vst [vmem:[#allocation2 + $0x390] sm:$0xff] %v648_v42  ;;  %784 = vst [vmem:[#allocation2 + $0x388] sm:$0xff] %v393_v43  ;;  %v650_v44 = vpop.f32.mrb[57].mxu1 }
 0x153   :  { %786 = vst [vmem:[#allocation2 + $0x398] sm:$0xff] %v650_v44 }
 0x154   :  { %v397_v45 = vpop.f32.mrb[58].mxu0 }
 0x155   :  { %787 = vst [vmem:[#allocation2 + $0x3a0] sm:$0xff] %v397_v45  ;;  %v654_v46 = vpop.f32.mrb[58].mxu1  ;;  %v399_v47 = vpop.f32.mrb[59].mxu0 }
 0x156   :  { %789 = vst [vmem:[#allocation2 + $0x3b0] sm:$0xff] %v654_v46  ;;  %788 = vst [vmem:[#allocation2 + $0x3a8] sm:$0xff] %v399_v47  ;;  %v656_v48 = vpop.f32.mrb[59].mxu1 }
 0x157   :  { %790 = vst [vmem:[#allocation2 + $0x3b8] sm:$0xff] %v656_v48 }
 0x158   :  { %v403_v49 = vpop.f32.mrb[60].mxu0 }
 0x159   :  { %791 = vst [vmem:[#allocation2 + $0x3c0] sm:$0xff] %v403_v49  ;;  %v660_v50 = vpop.f32.mrb[60].mxu1  ;;  %v405_v51 = vpop.f32.mrb[61].mxu0 }
 0x15a   :  { %793 = vst [vmem:[#allocation2 + $0x3d0] sm:$0xff] %v660_v50  ;;  %792 = vst [vmem:[#allocation2 + $0x3c8] sm:$0xff] %v405_v51  ;;  %v662_v52 = vpop.f32.mrb[61].mxu1 }
 0x15b   :  { %794 = vst [vmem:[#allocation2 + $0x3d8] sm:$0xff] %v662_v52 }
 0x15c   :  { %v409_v53 = vpop.f32.mrb[62].mxu0 }
 0x15d   :  { %795 = vst [vmem:[#allocation2 + $0x3e0] sm:$0xff] %v409_v53  ;;  %v666_v54 = vpop.f32.mrb[62].mxu1  ;;  %v411_v55 = vpop.f32.mrb[63].mxu0 }
 0x15e   :  { %797 = vst [vmem:[#allocation2 + $0x3f0] sm:$0xff] %v666_v54  ;;  %796 = vst [vmem:[#allocation2 + $0x3e8] sm:$0xff] %v411_v55  ;;  %v668_v56 = vpop.f32.mrb[63].mxu1 }
 0x15f   :  { %798 = vst [vmem:[#allocation2 + $0x3f8] sm:$0xff] %v668_v56 }
 0x160   :  { %910 = shalt.err (!%p907_p4)
}
 0x161   :  { %s911_s22 = scalar_lea.hbm %s1228_s2, 16384 }
 0x162   :  { %p912_p5 = scmp.ne.s32.totalorder %s1228_s2, %s911_s22  ;;  %p915_p6 = scmp.lt.u32.totalorder %s911_s22, %s1228_s2 }
 0x164   :  { %p917_p7 = pnand %p915_p6, %p912_p5 }
 0x166   :  { %920 = shalt.err (!%p917_p7)
}
 0x167   :  { %s925_s27 = smov 512   ;;  %s926_s28 = smov 32  }
 0x168   :  { %810 = dma.vmem_to_hbm [thread:$0]  %s805_s18, 16384, %s1228_s2, [#allocation3], %s925_s27, %s925_s27, %s926_s28  }
 0x169   :  { %921 = dma.done.wait [#allocation3], 16384  }
 0x16a   :  { %922 = vsyncadd [#allocation3], 4294950912 }
 0x16b   :  { %814 = vsyncpa [#allocation3], 1 }

</bundles_post_ra>
